<compile_context>
chip_gen: v5e
topology: v5e:2x2
jax: 0.10.0
libtpu: 0.0.40
codegen_flags: <defaults>
</compile_context>

<pallas_src>
import functools

import jax
import jax.numpy as jnp
from jax.experimental import pallas as pl
from jax.experimental.pallas import tpu as pltpu

CLIPMIN = 1e-05


def _scale_zp_inv(xmin, xmax, n_bits, symmetric):
    """scale / zero_point / 1/scale from per-token min & max (matches the PyTorch ref)."""
    qmax = float(2 ** n_bits - 1)
    if symmetric:
        q_sym = float(2 ** (n_bits - 1) - 1)
        abs_max = jnp.maximum(jnp.abs(xmax), jnp.abs(xmin))
        scale = jnp.clip(abs_max * (1.0 / q_sym), CLIPMIN, 10000.0)
        inv_scale = pl.reciprocal(scale, approx=False)   # exact: keep bit-faithful rounding
        zero_point = jnp.full_like(scale, q_sym)
    else:
        scale = jnp.clip((xmax - xmin) * (1.0 / qmax), CLIPMIN, 10000.0)
        inv_scale = pl.reciprocal(scale, approx=False)
        zero_point = -xmin * inv_scale
    zero_point = jnp.round(jnp.clip(zero_point, -10000.0, 10000.0))
    return scale, zero_point, inv_scale


def _fake_quant(x, scale, zero_point, inv_scale, n_bits):
    qmax = float(2 ** n_bits - 1)
    # clip(round(x/s) + zp, 0, qmax) - zp  ==  clip(round(x/s), -zp, qmax - zp)
    # (integer-valued f32 arithmetic, exactly equivalent; saves one add + one sub / elem)
    x_int = jnp.clip(jnp.round(x * inv_scale), -zero_point, qmax - zero_point)
    return x_int * scale


def _rowwise_kernel(x_ref, o_ref, *, n_bits, symmetric):
    """One token per row; reduce over the full last dim (cols >= 128, or rare fallback)."""
    x = x_ref[...].astype(jnp.float32)
    xmin = jnp.min(x, axis=-1, keepdims=True)
    xmax = jnp.max(x, axis=-1, keepdims=True)
    scale, zp, inv = _scale_zp_inv(xmin, xmax, n_bits, symmetric)
    o_ref[...] = _fake_quant(x, scale, zp, inv, n_bits).astype(o_ref.dtype)


def _folded_kernel(x_ref, o_ref, *, n_bits, symmetric, cols):
    """G = 128//cols tokens folded per lane-dense row; segmented min/max via roll trees."""
    x = x_ref[...].astype(jnp.float32)           # (T, L), L = G*cols, multiple of 128
    _, L = x.shape

    # Per-lane position inside its token segment (cols is a power of two).
    pos = jax.lax.broadcasted_iota(jnp.int32, (1, L), 1) & (cols - 1)
    steps = []
    s = 1
    while s < cols:
        # forward roll by s: source lane is (i - s)  -> same segment iff pos >= s
        # backward roll (L - s): source lane (i + s) -> same segment iff pos <  cols - s
        steps.append((s, pos >= s, pos < cols - s))
        s *= 2

    def seg_allreduce(v, op, neutral, first_rolls=None):
        a = v
        b = v
        for idx, (shift, m_fwd, m_bwd) in enumerate(steps):
            if idx == 0 and first_rolls is not None:
                ra, rb = first_rolls                      # shared between min/max trees
            else:
                ra = pltpu.roll(a, shift, axis=1)
                rb = pltpu.roll(b, L - shift, axis=1)
            a = op(a, jnp.where(m_fwd, ra, neutral))
            b = op(b, jnp.where(m_bwd, rb, neutral))
        return op(a, b)      # every lane now holds its own segment's reduction

    if steps:
        shift0 = steps[0][0]
        first_rolls = (pltpu.roll(x, shift0, axis=1), pltpu.roll(x, L - shift0, axis=1))
    else:
        first_rolls = None

    xmin = seg_allreduce(x, jnp.minimum, jnp.inf, first_rolls)
    xmax = seg_allreduce(x, jnp.maximum, -jnp.inf, first_rolls)
    scale, zp, inv = _scale_zp_inv(xmin, xmax, n_bits, symmetric)
    o_ref[...] = _fake_quant(x, scale, zp, inv, n_bits).astype(o_ref.dtype)


def _choose_row_tile(n_rows, row_bytes, target_block_bytes, sublane):
    """Largest row tile (multiple of `sublane`) under the byte budget, aiming for >= 4
    grid steps (>= 2 double-buffered blocks per TensorCore on v7x) and an even step
    count when the grid is small."""
    if n_rows <= sublane:
        return n_rows                            # block == full array dim (legal), tiny input
    budget_rows = max(sublane, target_block_bytes // max(row_bytes, 1))
    if n_rows >= 4 * sublane:
        min_steps = 4                            # >= 2 pipelined blocks per TC on v7x
    elif n_rows >= 2 * sublane:
        min_steps = 2                            # at least double-buffer on 1-TC chips
    else:
        min_steps = 1
    cap_rows = max(sublane, n_rows // min_steps)
    tile = min(n_rows, budget_rows, cap_rows)
    tile = max(sublane, (tile // sublane) * sublane)
    # A small odd step count leaves one v7x TensorCore a block short; nudge to even.
    steps = -(-n_rows // tile)
    if 1 < steps <= 8 and steps % 2 == 1:
        alt = -(-n_rows // (steps + 1))
        alt = max(sublane, -(-alt // sublane) * sublane)
        if -(-n_rows // alt) % 2 == 0:
            tile = alt
    return tile


def uniform_affine_quantize(x, *, n_bits=8, symmetric=False, group_size=None,
                            target_block_bytes=2 << 20):
    """Forward pass of UniformAffineQuantizer (per-token dynamic fake quantization)."""
    assert 2 <= n_bits <= 16, "bitwidth not supported"
    if n_bits >= 16:
        return x            # matches the PyTorch forward: >= 16 bits is a pass-through

    orig_shape = x.shape
    if group_size is not None:
        assert x.ndim == 2, "only support linear layer now"
        assert (orig_shape[0] * orig_shape[1]) % group_size == 0, \
            "group_size must divide the number of elements"
        x2d = x.reshape(-1, group_size)
    else:
        x2d = x.reshape(-1, orig_shape[-1])
    rows, cols = x2d.shape

    itemsize = x.dtype.itemsize
    sublane = max(8, 32 // max(itemsize, 1))     # 8 (f32) / 16 (bf16) / 32 (int8, fp8)

    # Lane-dense folding: pack G = 128//cols tokens per 128-lane row when cols is a small
    # divisor of 128 and no padding is required (reshape of a contiguous array is free).
    fold = (cols < 128) and (128 % cols == 0) and (rows % (128 // cols) == 0)
    if fold:
        g = 128 // cols
        xk = x2d.reshape(-1, g * cols)
        kernel = functools.partial(_folded_kernel, n_bits=n_bits,
                                   symmetric=symmetric, cols=cols)
    else:
        # TODO(synk): when cols < 128 but rows % (128//cols) != 0 we skip lane folding
        # instead of padding (avoids whole-array pad/slice HBM passes); stores in this
        # rare case are lane-masked.
        xk = x2d
        kernel = functools.partial(_rowwise_kernel, n_bits=n_bits, symmetric=symmetric)

    krows, kcols = xk.shape
    row_tile = _choose_row_tile(krows, kcols * itemsize, target_block_bytes, sublane)
    # Ragged last block is handled by Pallas boundary masking: OOB reads give garbage
    # rows (rows are independent and those rows are never stored); OOB stores dropped.
    grid = (pl.cdiv(krows, row_tile),)

    out = pl.pallas_call(
        kernel,
        out_shape=jax.ShapeDtypeStruct(xk.shape, x.dtype),
        grid=grid,
        in_specs=[pl.BlockSpec((row_tile, kcols), lambda i: (i, 0))],
        out_specs=pl.BlockSpec((row_tile, kcols), lambda i: (i, 0)),
        compiler_params=pltpu.CompilerParams(
            dimension_semantics=("parallel",),
            vmem_limit_bytes=48 * 1024 * 1024),
    )(xk)

    # Reshapes of contiguous arrays are free (no extra HBM pass); no slices needed.
    return out.reshape(orig_shape)


def _reference(x, *, n_bits=8, symmetric=False, group_size=None):
    """Pure-JAX reference mirroring the PyTorch module (same reciprocal formulation
    as the kernel, which differs from torch's a/b by at most 1 ulp before rounding)."""
    if n_bits >= 16:
        return x
    orig_shape = x.shape
    xr = x.reshape(-1, group_size) if group_size else x.reshape(-1, orig_shape[-1])
    xr = xr.astype(jnp.float32)
    xmin = jnp.min(xr, axis=-1, keepdims=True)
    xmax = jnp.max(xr, axis=-1, keepdims=True)
    qmax = float(2 ** n_bits - 1)
    if symmetric:
        q_sym = float(2 ** (n_bits - 1) - 1)
        abs_max = jnp.maximum(jnp.abs(xmax), jnp.abs(xmin))
        scale = jnp.clip(abs_max * (1.0 / q_sym), CLIPMIN, 10000.0)
        inv = 1.0 / scale
        zp = jnp.full_like(scale, q_sym)
    else:
        scale = jnp.clip((xmax - xmin) * (1.0 / qmax), CLIPMIN, 10000.0)
        inv = 1.0 / scale
        zp = -xmin * inv
    zp = jnp.round(jnp.clip(zp, -10000.0, 10000.0))
    x_int = jnp.clip(jnp.round(xr * inv) + zp, 0.0, qmax)
    x_deq = (x_int - zp) * scale
    return x_deq.reshape(orig_shape).astype(x.dtype)


if __name__ == "__main__":
    key = jax.random.PRNGKey(0)
    k1, k2, k3, k4, k5, k6 = jax.random.split(key, 6)

    # 1) NCHW conv activation, per-token (last dim W=16), asymmetric 8-bit.
    #    Folded path (8 tokens per 128-lane row), 2 pipelined grid steps.
    x = jax.random.normal(k1, (2, 4, 16, 16), dtype=jnp.float32) * 3.0
    out = jax.block_until_ready(uniform_affine_quantize(x, n_bits=8, symmetric=False))
    ref = _reference(x, n_bits=8, symmetric=False)
    assert out.shape == x.shape and out.dtype == x.dtype
    assert jnp.allclose(out, ref, atol=1e-5, rtol=1e-5), "asym NCHW mismatch"

    # 2) Linear-layer weight with group_size=16 (folded path, tiny full block).
    w = jax.random.normal(k2, (8, 32), dtype=jnp.float32)
    out_g = jax.block_until_ready(
        uniform_affine_quantize(w, n_bits=8, symmetric=False, group_size=16))
    ref_g = _reference(w, n_bits=8, symmetric=False, group_size=16)
    assert jnp.allclose(out_g, ref_g, atol=1e-5, rtol=1e-5), "group mismatch"

    # 3) Symmetric 8-bit on a wide activation (row-wise kernel, 4 grid steps).
    a = jax.random.normal(k3, (4, 8, 256), dtype=jnp.float32)
    out_s = jax.block_until_ready(uniform_affine_quantize(a, n_bits=8, symmetric=True))
    ref_s = _reference(a, n_bits=8, symmetric=True)
    assert jnp.allclose(out_s, ref_s, atol=1e-5, rtol=1e-5), "symmetric mismatch"

    # 4) Odd row count (ragged last block, no padding) with 4-bit quantization.
    b = jax.random.normal(k4, (3, 5, 256), dtype=jnp.float32)
    out_b = jax.block_until_ready(uniform_affine_quantize(b, n_bits=4, symmetric=False))
    ref_b = _reference(b, n_bits=4, symmetric=False)
    assert jnp.allclose(out_b, ref_b, atol=1e-5, rtol=1e-5), "4-bit mismatch"

    # 5) Narrow last dim with a token count not divisible by the fold factor
    #    (exercises the no-pad rowwise fallback + ragged masking).
    c = jax.random.normal(k5, (3, 7, 16), dtype=jnp.float32)
    out_c = jax.block_until_ready(uniform_affine_quantize(c, n_bits=8, symmetric=False))
    ref_c = _reference(c, n_bits=8, symmetric=False)
    assert jnp.allclose(out_c, ref_c, atol=1e-5, rtol=1e-5), "fallback mismatch"

    # 6) bf16 input (dtype-aware sublane alignment: row tile multiple of 16).
    xb = (jax.random.normal(k6, (4, 8, 256), dtype=jnp.float32) * 3.0).astype(jnp.bfloat16)
    out_bf = jax.block_until_ready(uniform_affine_quantize(xb, n_bits=8, symmetric=True))
    ref_bf = _reference(xb, n_bits=8, symmetric=True)
    assert out_bf.dtype == jnp.bfloat16
    assert jnp.allclose(out_bf.astype(jnp.float32), ref_bf.astype(jnp.float32),
                        atol=1e-2, rtol=1e-2), "bf16 mismatch"

    print("KERNEL_OK")
</pallas_src>

<mosaic_0001>
module attributes {stable_mosaic.version = 11 : i64} {
  func.func @_folded_kernel(%arg0: i32, %arg1: memref<8x128xf32, #tpu.memory_space<vmem>>, %arg2: memref<8x128xf32, #tpu.memory_space<vmem>>) attributes {dimension_semantics = [#tpu.dimension_semantics<parallel>], iteration_bounds = array<i64: 2>, scalar_prefetch = 0 : i64, scratch_operands = 0 : i64, tpu.core_type = #tpu.core_type<tc>, window_params = [{transform_indices = @transform_0, window_bounds = array<i64: 8, 128>}, {transform_indices = @transform_1, window_bounds = array<i64: 8, 128>}]} {
    %c0 = arith.constant 0 : index
    %c0_0 = arith.constant 0 : index
    %0 = vector.load %arg1[%c0, %c0_0] : memref<8x128xf32, #tpu.memory_space<vmem>>, vector<8x128xf32>
    %1 = tpu.iota {dimensions = array<i32: 1>} : vector<1x128xi32>
    %c15_i32 = arith.constant 15 : i32
    %2 = vector.broadcast %c15_i32 : i32 to vector<1x128xi32>
    %3 = arith.andi %1, %2 : vector<1x128xi32>
    %c1_i32 = arith.constant 1 : i32
    %4 = vector.broadcast %c1_i32 : i32 to vector<1x128xi32>
    %5 = arith.cmpi sge, %3, %4 : vector<1x128xi32>
    %c15_i32_1 = arith.constant 15 : i32
    %6 = vector.broadcast %c15_i32_1 : i32 to vector<1x128xi32>
    %7 = arith.cmpi slt, %3, %6 : vector<1x128xi32>
    %c2_i32 = arith.constant 2 : i32
    %8 = vector.broadcast %c2_i32 : i32 to vector<1x128xi32>
    %9 = arith.cmpi sge, %3, %8 : vector<1x128xi32>
    %c14_i32 = arith.constant 14 : i32
    %10 = vector.broadcast %c14_i32 : i32 to vector<1x128xi32>
    %11 = arith.cmpi slt, %3, %10 : vector<1x128xi32>
    %c4_i32 = arith.constant 4 : i32
    %12 = vector.broadcast %c4_i32 : i32 to vector<1x128xi32>
    %13 = arith.cmpi sge, %3, %12 : vector<1x128xi32>
    %c12_i32 = arith.constant 12 : i32
    %14 = vector.broadcast %c12_i32 : i32 to vector<1x128xi32>
    %15 = arith.cmpi slt, %3, %14 : vector<1x128xi32>
    %c8_i32 = arith.constant 8 : i32
    %16 = vector.broadcast %c8_i32 : i32 to vector<1x128xi32>
    %17 = arith.cmpi sge, %3, %16 : vector<1x128xi32>
    %c8_i32_2 = arith.constant 8 : i32
    %18 = vector.broadcast %c8_i32_2 : i32 to vector<1x128xi32>
    %19 = arith.cmpi slt, %3, %18 : vector<1x128xi32>
    %c1_i32_3 = arith.constant 1 : i32
    %20 = tpu.dynamic_rotate %0 by %c1_i32_3 dim 1 : vector<8x128xf32>, i32 -> vector<8x128xf32>
    %c127_i32 = arith.constant 127 : i32
    %21 = tpu.dynamic_rotate %0 by %c127_i32 dim 1 : vector<8x128xf32>, i32 -> vector<8x128xf32>
    %cst = arith.constant 0x7F800000 : f32
    %22 = vector.shape_cast %5 : vector<1x128xi1> to vector<1x128xi1>
    %23 = vector.broadcast %22 : vector<1x128xi1> to vector<8x128xi1>
    %24 = vector.broadcast %cst : f32 to vector<8x128xf32>
    %25 = arith.select %23, %20, %24 : vector<8x128xi1>, vector<8x128xf32>
    %26 = arith.minimumf %0, %25 : vector<8x128xf32>
    %cst_4 = arith.constant 0x7F800000 : f32
    %27 = vector.shape_cast %7 : vector<1x128xi1> to vector<1x128xi1>
    %28 = vector.broadcast %27 : vector<1x128xi1> to vector<8x128xi1>
    %29 = vector.broadcast %cst_4 : f32 to vector<8x128xf32>
    %30 = arith.select %28, %21, %29 : vector<8x128xi1>, vector<8x128xf32>
    %31 = arith.minimumf %0, %30 : vector<8x128xf32>
    %c2_i32_5 = arith.constant 2 : i32
    %32 = tpu.dynamic_rotate %26 by %c2_i32_5 dim 1 : vector<8x128xf32>, i32 -> vector<8x128xf32>
    %c126_i32 = arith.constant 126 : i32
    %33 = tpu.dynamic_rotate %31 by %c126_i32 dim 1 : vector<8x128xf32>, i32 -> vector<8x128xf32>
    %cst_6 = arith.constant 0x7F800000 : f32
    %34 = vector.shape_cast %9 : vector<1x128xi1> to vector<1x128xi1>
    %35 = vector.broadcast %34 : vector<1x128xi1> to vector<8x128xi1>
    %36 = vector.broadcast %cst_6 : f32 to vector<8x128xf32>
    %37 = arith.select %35, %32, %36 : vector<8x128xi1>, vector<8x128xf32>
    %38 = arith.minimumf %26, %37 : vector<8x128xf32>
    %cst_7 = arith.constant 0x7F800000 : f32
    %39 = vector.shape_cast %11 : vector<1x128xi1> to vector<1x128xi1>
    %40 = vector.broadcast %39 : vector<1x128xi1> to vector<8x128xi1>
    %41 = vector.broadcast %cst_7 : f32 to vector<8x128xf32>
    %42 = arith.select %40, %33, %41 : vector<8x128xi1>, vector<8x128xf32>
    %43 = arith.minimumf %31, %42 : vector<8x128xf32>
    %c4_i32_8 = arith.constant 4 : i32
    %44 = tpu.dynamic_rotate %38 by %c4_i32_8 dim 1 : vector<8x128xf32>, i32 -> vector<8x128xf32>
    %c124_i32 = arith.constant 124 : i32
    %45 = tpu.dynamic_rotate %43 by %c124_i32 dim 1 : vector<8x128xf32>, i32 -> vector<8x128xf32>
    %cst_9 = arith.constant 0x7F800000 : f32
    %46 = vector.shape_cast %13 : vector<1x128xi1> to vector<1x128xi1>
    %47 = vector.broadcast %46 : vector<1x128xi1> to vector<8x128xi1>
    %48 = vector.broadcast %cst_9 : f32 to vector<8x128xf32>
    %49 = arith.select %47, %44, %48 : vector<8x128xi1>, vector<8x128xf32>
    %50 = arith.minimumf %38, %49 : vector<8x128xf32>
    %cst_10 = arith.constant 0x7F800000 : f32
    %51 = vector.shape_cast %15 : vector<1x128xi1> to vector<1x128xi1>
    %52 = vector.broadcast %51 : vector<1x128xi1> to vector<8x128xi1>
    %53 = vector.broadcast %cst_10 : f32 to vector<8x128xf32>
    %54 = arith.select %52, %45, %53 : vector<8x128xi1>, vector<8x128xf32>
    %55 = arith.minimumf %43, %54 : vector<8x128xf32>
    %c8_i32_11 = arith.constant 8 : i32
    %56 = tpu.dynamic_rotate %50 by %c8_i32_11 dim 1 : vector<8x128xf32>, i32 -> vector<8x128xf32>
    %c120_i32 = arith.constant 120 : i32
    %57 = tpu.dynamic_rotate %55 by %c120_i32 dim 1 : vector<8x128xf32>, i32 -> vector<8x128xf32>
    %cst_12 = arith.constant 0x7F800000 : f32
    %58 = vector.shape_cast %17 : vector<1x128xi1> to vector<1x128xi1>
    %59 = vector.broadcast %58 : vector<1x128xi1> to vector<8x128xi1>
    %60 = vector.broadcast %cst_12 : f32 to vector<8x128xf32>
    %61 = arith.select %59, %56, %60 : vector<8x128xi1>, vector<8x128xf32>
    %62 = arith.minimumf %50, %61 : vector<8x128xf32>
    %cst_13 = arith.constant 0x7F800000 : f32
    %63 = vector.shape_cast %19 : vector<1x128xi1> to vector<1x128xi1>
    %64 = vector.broadcast %63 : vector<1x128xi1> to vector<8x128xi1>
    %65 = vector.broadcast %cst_13 : f32 to vector<8x128xf32>
    %66 = arith.select %64, %57, %65 : vector<8x128xi1>, vector<8x128xf32>
    %67 = arith.minimumf %55, %66 : vector<8x128xf32>
    %68 = arith.minimumf %62, %67 : vector<8x128xf32>
    %cst_14 = arith.constant 0xFF800000 : f32
    %69 = vector.shape_cast %5 : vector<1x128xi1> to vector<1x128xi1>
    %70 = vector.broadcast %69 : vector<1x128xi1> to vector<8x128xi1>
    %71 = vector.broadcast %cst_14 : f32 to vector<8x128xf32>
    %72 = arith.select %70, %20, %71 : vector<8x128xi1>, vector<8x128xf32>
    %73 = arith.maximumf %0, %72 : vector<8x128xf32>
    %cst_15 = arith.constant 0xFF800000 : f32
    %74 = vector.shape_cast %7 : vector<1x128xi1> to vector<1x128xi1>
    %75 = vector.broadcast %74 : vector<1x128xi1> to vector<8x128xi1>
    %76 = vector.broadcast %cst_15 : f32 to vector<8x128xf32>
    %77 = arith.select %75, %21, %76 : vector<8x128xi1>, vector<8x128xf32>
    %78 = arith.maximumf %0, %77 : vector<8x128xf32>
    %c2_i32_16 = arith.constant 2 : i32
    %79 = tpu.dynamic_rotate %73 by %c2_i32_16 dim 1 : vector<8x128xf32>, i32 -> vector<8x128xf32>
    %c126_i32_17 = arith.constant 126 : i32
    %80 = tpu.dynamic_rotate %78 by %c126_i32_17 dim 1 : vector<8x128xf32>, i32 -> vector<8x128xf32>
    %cst_18 = arith.constant 0xFF800000 : f32
    %81 = vector.shape_cast %9 : vector<1x128xi1> to vector<1x128xi1>
    %82 = vector.broadcast %81 : vector<1x128xi1> to vector<8x128xi1>
    %83 = vector.broadcast %cst_18 : f32 to vector<8x128xf32>
    %84 = arith.select %82, %79, %83 : vector<8x128xi1>, vector<8x128xf32>
    %85 = arith.maximumf %73, %84 : vector<8x128xf32>
    %cst_19 = arith.constant 0xFF800000 : f32
    %86 = vector.shape_cast %11 : vector<1x128xi1> to vector<1x128xi1>
    %87 = vector.broadcast %86 : vector<1x128xi1> to vector<8x128xi1>
    %88 = vector.broadcast %cst_19 : f32 to vector<8x128xf32>
    %89 = arith.select %87, %80, %88 : vector<8x128xi1>, vector<8x128xf32>
    %90 = arith.maximumf %78, %89 : vector<8x128xf32>
    %c4_i32_20 = arith.constant 4 : i32
    %91 = tpu.dynamic_rotate %85 by %c4_i32_20 dim 1 : vector<8x128xf32>, i32 -> vector<8x128xf32>
    %c124_i32_21 = arith.constant 124 : i32
    %92 = tpu.dynamic_rotate %90 by %c124_i32_21 dim 1 : vector<8x128xf32>, i32 -> vector<8x128xf32>
    %cst_22 = arith.constant 0xFF800000 : f32
    %93 = vector.shape_cast %13 : vector<1x128xi1> to vector<1x128xi1>
    %94 = vector.broadcast %93 : vector<1x128xi1> to vector<8x128xi1>
    %95 = vector.broadcast %cst_22 : f32 to vector<8x128xf32>
    %96 = arith.select %94, %91, %95 : vector<8x128xi1>, vector<8x128xf32>
    %97 = arith.maximumf %85, %96 : vector<8x128xf32>
    %cst_23 = arith.constant 0xFF800000 : f32
    %98 = vector.shape_cast %15 : vector<1x128xi1> to vector<1x128xi1>
    %99 = vector.broadcast %98 : vector<1x128xi1> to vector<8x128xi1>
    %100 = vector.broadcast %cst_23 : f32 to vector<8x128xf32>
    %101 = arith.select %99, %92, %100 : vector<8x128xi1>, vector<8x128xf32>
    %102 = arith.maximumf %90, %101 : vector<8x128xf32>
    %c8_i32_24 = arith.constant 8 : i32
    %103 = tpu.dynamic_rotate %97 by %c8_i32_24 dim 1 : vector<8x128xf32>, i32 -> vector<8x128xf32>
    %c120_i32_25 = arith.constant 120 : i32
    %104 = tpu.dynamic_rotate %102 by %c120_i32_25 dim 1 : vector<8x128xf32>, i32 -> vector<8x128xf32>
    %cst_26 = arith.constant 0xFF800000 : f32
    %105 = vector.shape_cast %17 : vector<1x128xi1> to vector<1x128xi1>
    %106 = vector.broadcast %105 : vector<1x128xi1> to vector<8x128xi1>
    %107 = vector.broadcast %cst_26 : f32 to vector<8x128xf32>
    %108 = arith.select %106, %103, %107 : vector<8x128xi1>, vector<8x128xf32>
    %109 = arith.maximumf %97, %108 : vector<8x128xf32>
    %cst_27 = arith.constant 0xFF800000 : f32
    %110 = vector.shape_cast %19 : vector<1x128xi1> to vector<1x128xi1>
    %111 = vector.broadcast %110 : vector<1x128xi1> to vector<8x128xi1>
    %112 = vector.broadcast %cst_27 : f32 to vector<8x128xf32>
    %113 = arith.select %111, %104, %112 : vector<8x128xi1>, vector<8x128xf32>
    %114 = arith.maximumf %102, %113 : vector<8x128xf32>
    %115 = arith.maximumf %109, %114 : vector<8x128xf32>
    %116 = arith.subf %115, %68 : vector<8x128xf32>
    %cst_28 = arith.constant 0.00392156886 : f32
    %117 = vector.broadcast %cst_28 : f32 to vector<8x128xf32>
    %118 = arith.mulf %116, %117 : vector<8x128xf32>
    %cst_29 = arith.constant 9.99999974E-6 : f32
    %cst_30 = arith.constant 1.000000e+04 : f32
    %119 = vector.broadcast %cst_29 : f32 to vector<8x128xf32>
    %120 = arith.maximumf %119, %118 : vector<8x128xf32>
    %121 = vector.broadcast %cst_30 : f32 to vector<8x128xf32>
    %122 = arith.minimumf %121, %120 : vector<8x128xf32>
    %123 = tpu.reciprocal %122 : vector<8x128xf32> -> vector<8x128xf32>
    %cst_31 = arith.constant 0.000000e+00 : f32
    %124 = vector.broadcast %cst_31 : f32 to vector<8x128xf32>
    %125 = arith.subf %124, %68 : vector<8x128xf32>
    %126 = arith.mulf %125, %123 : vector<8x128xf32>
    %cst_32 = arith.constant -1.000000e+04 : f32
    %cst_33 = arith.constant 1.000000e+04 : f32
    %127 = vector.broadcast %cst_32 : f32 to vector<8x128xf32>
    %128 = arith.maximumf %127, %126 : vector<8x128xf32>
    %129 = vector.broadcast %cst_33 : f32 to vector<8x128xf32>
    %130 = arith.minimumf %129, %128 : vector<8x128xf32>
    %131 = math.roundeven %130 : vector<8x128xf32>
    %132 = arith.mulf %0, %123 : vector<8x128xf32>
    %133 = math.roundeven %132 : vector<8x128xf32>
    %cst_34 = arith.constant 0.000000e+00 : f32
    %134 = vector.broadcast %cst_34 : f32 to vector<8x128xf32>
    %135 = arith.subf %134, %131 : vector<8x128xf32>
    %cst_35 = arith.constant 2.550000e+02 : f32
    %136 = vector.broadcast %cst_35 : f32 to vector<8x128xf32>
    %137 = arith.subf %136, %131 : vector<8x128xf32>
    %138 = arith.maximumf %135, %133 : vector<8x128xf32>
    %139 = arith.minimumf %137, %138 : vector<8x128xf32>
    %140 = arith.mulf %139, %122 : vector<8x128xf32>
    %c0_36 = arith.constant 0 : index
    %c0_37 = arith.constant 0 : index
    %141 = vector.load %arg2[%c0_36, %c0_37] : memref<8x128xf32, #tpu.memory_space<vmem>>, vector<8x128xf32>
    tpu.vector_store %arg2[%c0_36, %c0_37], %140 {strides = array<i32>} : memref<8x128xf32, #tpu.memory_space<vmem>>, vector<8x128xf32>,
    return
  }
  func.func @transform_0(%arg0: i32) -> (i32, i32) {
    %c0_i32 = arith.constant 0 : i32
    %c0_i32_0 = arith.constant 0 : i32
    return %arg0, %c0_i32 : i32, i32
  }
  func.func @transform_1(%arg0: i32) -> (i32, i32) {
    %c0_i32 = arith.constant 0 : i32
    %c0_i32_0 = arith.constant 0 : i32
    return %arg0, %c0_i32 : i32, i32
  }
}

</mosaic_0001>

<bundles_post_ra>
// kernel: tpu_custom_call.1
= control target key start
LH: loop header
LB: loop body
LE: loop exit
PB: predicated region body
PF: predicated region fallthrough
CT: control target
= control target key end

     0   :  { %6 = vsyncpa [#allocation3], 0  ;;  %s692_s0 = inlined_call_operand.hbm [shape: f32[16,128], index: 0, kind: input, shape index: {}]   ;;  %s693_s1 = inlined_call_operand.hbm [shape: f32[16,128], index: 1, kind: output, shape index: {}]  }
   0x1   :  { %8 = vsyncpa [#allocation3 + $0x1], 0 }
   0x2   :  { %9 = vsyncpa [#allocation4], 0 }
   0x3   :  { %11 = vsyncpa [#allocation4 + $0x1], 0  ;;  %s542_s6 = smov 0   ;;  %s544_s7 = smov 0  }
   0x4   :  { %s546_s8 = smov 0   ;;  %s548_s9 = smov 0  }
   0x5 LB: > { %s563_s10 = sadd.s32 4294967295, %s522_s9   ;;  %s341_s11 = sadd.s32 4294967294, %s522_s9   ;;  %s522_s9 = sphi %s548_s9, %s703_s9   ;;  %s518_s8 = sphi %s546_s8, %s702_s8   ;;  %s514_s7 = sphi %s544_s7, %s701_s7   ;;  %s510_s6 = sphi %s542_s6, %s700_s6  }
   0x6   : > { %s567_s12 = sadd.s32 1, %s522_s9   ;;  %s24_s13 = sadd.s32 1, %s518_s8 }
   0x7   : > { %s21_s14 = ssub.s32 %s522_s9, %s567_s12  ;;  %p31_p0 = scmp.ne.s32.totalorder %s518_s8, %s514_s7 }
   0x8   : > { %p22_p1 = scmp.eq.s32.totalorder %s21_s14, 0  ;;  %p32_p2 = scmp.eq.s32.totalorder %s522_s9, 0 }
   0x9   : > { %p37_p3 = scmp.ne.s32.totalorder %s514_s7, %s510_s6  ;;  %p38_p4 = scmp.eq.s32.totalorder %s563_s10, 0 }
   0xa   : > { %s579_s15 = scalar_select %p22_p1, %s518_s8, %s24_s13  }
   0xb   : > { %p581_p5 = por %p32_p2, %p31_p0  ;;  %p585_p6 = por %p38_p4, %p37_p3 }
   0xc   : > { %p61_p7 = scmp.eq.s32.totalorder %s563_s10, 1  ;;  %p67_p8 = scmp.eq.s32.totalorder %s341_s11, 1 }
   0xd   : > { %p382_p10 = scmp.lt.s32.totalorder %s522_s9, 2  ;;  %s87_s20 = sand.u32 1, %s518_s8  }
   0xe   : > { %p592_p11 = por %p61_p7, %p31_p0  ;;  %p596_p12 = por %p67_p8, %p37_p3 }
   0xf   : > { %s345_s21 = sshll.u32 %s522_s9, 3  ;;  %s344_s22 = sshll.u32 %s87_s20, 3 }
  0x10   : > { %s95_s25 = scalar_lea.hbm %s692_s0, %s345_s21  ;;  %s91_s27 = scalar_lea.vmem [#allocation2], %s344_s22 }
  0x11   : > { %s97_s26 = sshll.u32 %s95_s25, 4  ;;  %s99_s28 = sshll.u32 %s91_s27, 4  ;;  %s98_s26 = int_to_ptr.hbm [resolvable:$true] %s97_s26  ;;  %s100_s28 = int_to_ptr.vmem [resolvable:$true] %s99_s28 }
  0x12   : > { %p607_p13 = pnand %p382_p10, %p581_p5  ;;  %p346_p0 = scmp.ge.s32.totalorder %s522_s9, 1 }
  0x13   : > { %p104_p1 = scmp.lt.s32.totalorder %s522_s9, 3  ;;  %s88_s30 = scalar_lea.sflag [#allocation3], %s87_s20 }
  0x14   : > { %s426_s2 = sshra.s32 %s98_s26, 4  ;;  %p430_p3 = pneg %p607_p13  ;;  %s427_s2 = int_to_ptr.hbm [resolvable:$true] %s426_s2 }
  0x15   : > { %s428_s3 = scalar_lea.hbm %s427_s2, 8  ;;  %s433_s11 = scalar_lea.hbm %s692_s0, 16 }
  0x16   : > { %p429_p2 = scmp.ne.s32.totalorder %s427_s2, %s428_s3  ;;  %p434_p5 = scmp.lt.s32.totalorder %s427_s2, %s692_s0 }
  0x17   : > { %p435_p8 = scmp.lt.s32.totalorder %s433_s11, %s428_s3 }
  0x18   : > { %p431_p4 = pnand %p430_p3, %p429_p2 }
  0x19   : > { %p436_p10 = por %p435_p8, %p434_p5 }
  0x1a   : > { %p432_p7 = pneg %p431_p4 }
  0x1c   : > { %p437_p9 = pnand %p436_p10, %p432_p7 }
  0x1e   : > { %440 = shalt.err (!%p437_p9)
}
  0x1f   : > { %377 = dma.hbm_to_vmem [thread:$0]  (!%p607_p13), %s98_s26, 128, %s100_s28, %s88_s30  }
  0x20   : > { %p105_p2 = pnand %p346_p0, %p104_p1 }
  0x21   : > { %s628_s16 = sand.u32 (!%p105_p2), 1, %s514_s7  }
  0x22   : > { %108 = sbr.rel (%p105_p2) target bundleno = 572 (0x23c), region = 24  ;;  %s347_s20 = sshll.u32 (!%p105_p2), %s628_s16, 3 }
  0x23   : > { %s111_s21 = scalar_lea.sflag (!%p105_p2), [#allocation3], %s628_s16  ;;  %s114_s22 = scalar_lea.vmem (!%p105_p2), [#allocation2], %s347_s20 }
  0x27   : > { %501 = dma.done.wait (%p585_p6), %s111_s21, 128  }
  0x28   : > { %503 = vsyncadd (%p585_p6), %s111_s21, 4294967168  ;;  %v638_v0 = vld [vmem:[%s114_s22] sm:$0xff]  ;;  %s524_s23 = smov 1   ;;  %s525_s24 = smov 127   ;;  %v135_v1 = vlaneseq }
  0x29   : > { %146 = vrot.lane.b32.xlu0 %v638_v0, %s524_s23  ;;  %s526_s17 = smov 2   ;;  %s527_s25 = smov 126  }
  0x2a   : > { %v136_v2 = vand.u32 127, %v135_v1  ;;  %s528_s26 = smov 4   ;;  %s529_s27 = smov 124  }
  0x2b   : > { %s530_s28 = smov 8   ;;  %s531_s29 = smov 120  }
  0x2c   : > { %v642_v3 = vand.u32 15, %v136_v2  ;;  %s351_s30 = sshll.u32 %s563_s10, 3  ;;  %s133_s5 = scalar_lea.vmem [#allocation5], %s347_s20 }
  0x2d   : > { %s266_s4 = scalar_lea.hbm %s693_s1, %s351_s30  ;;  %s268_s11 = sshll.u32 %s133_s5, 4  ;;  %s269_s11 = int_to_ptr.vmem [resolvable:$true] %s268_s11 }
  0x2e   : > { %vm138_vm0 = vcmp.ge.s32.totalorder %v642_v3, 1  ;;  %vm139_vm1 = vcmp.lt.s32.totalorder %v642_v3, 15  ;;  %vm140_vm2 = vcmp.ge.s32.totalorder %v642_v3, 2  ;;  %vm141_vm3 = vcmp.lt.s32.totalorder %v642_v3, 14  ;;  %s270_s13 = sshll.u32 %s266_s4, 4  ;;  %s256_s10 = scalar_lea.sflag [#allocation4], %s628_s16  ;;  %s271_s13 = int_to_ptr.hbm [resolvable:$true] %s270_s13 }
  0x2f   : > { %vm142_vm4 = vcmp.ge.s32.totalorder %v642_v3, 4  ;;  %vm143_vm5 = vcmp.lt.s32.totalorder %v642_v3, 12  ;;  %vm144_vm6 = vcmp.ge.s32.totalorder %v642_v3, 8  ;;  %vm145_vm7 = vcmp.lt.s32.totalorder %v642_v3, 8  ;;  %s470_s14 = sshra.s32 %s271_s13, 4  ;;  %s471_s14 = int_to_ptr.hbm [resolvable:$true] %s470_s14 }
  0x30   : > { %s472_s21 = scalar_lea.hbm %s471_s14, 8  ;;  %p477_p0 = scmp.lt.s32.totalorder %s471_s14, %s693_s1 }
  0x31   : > { %148 = vrot.lane.b32.xlu0 %v638_v0, %s525_s24  ;;  %p473_p6 = scmp.ne.s32.totalorder %s471_s14, %s472_s21  ;;  %s476_s24 = scalar_lea.hbm %s693_s1, 16 }
  0x32   : > { %p478_p1 = scmp.lt.s32.totalorder %s476_s24, %s472_s21 }
  0x33   : > { %p474_p9 = pnand %p473_p6, %p592_p11 }
  0x34   : > { %p479_p3 = por %p478_p1, %p477_p0 }
  0x35   : > { %p475_p13 = pneg %p474_p9 }
  0x37   : > { %p480_p4 = pnand %p479_p3, %p475_p13 }
  0x9b   : > { %v147_v4 = vpop.permute.xlu0 %146 }
  0x9c   : > { %v152_v5 = vsel %vm138_vm0, %v147_v4, inf  ;;  %v195_v6 = vsel %vm138_vm0, %v147_v4, -inf }
  0x9d   : > { %v196_v7 = vmax.f32 %v638_v0, %v195_v6  ;;  %v153_v8 = vmin.f32 %v638_v0, %v152_v5 }
  0x9f   : > { %199 = vrot.lane.b32.xlu2 %v196_v7, %s526_s17  ;;  %158 = vrot.lane.b32.xlu1 %v153_v8, %s526_s17 }
  0xa3   : > { %v149_v9 = vpop.permute.xlu0 %148 }
  0xa4   : > { %v156_v10 = vsel %vm139_vm1, %v149_v9, inf  ;;  %v197_v11 = vsel %vm139_vm1, %v149_v9, -inf }
  0xa5   : > { %v157_v12 = vmin.f32 %v638_v0, %v156_v10  ;;  %v198_v13 = vmax.f32 %v638_v0, %v197_v11 }
  0xa7   : > { %201 = vrot.lane.b32.xlu2 %v198_v13, %s527_s25  ;;  %160 = vrot.lane.b32.xlu1 %v157_v12, %s527_s25 }
  0xf9   : > { %v200_v14 = vpop.permute.xlu2 %199 }
  0xfa   : > { %v203_v15 = vsel %vm140_vm2, %v200_v14, -inf }
  0xfb   : > { %v204_v16 = vmax.f32 %v196_v7, %v203_v15 }
  0xfd   : > { %207 = vrot.lane.b32.xlu2 %v204_v16, %s528_s26 }
 0x101   : > { %v202_v20 = vpop.permute.xlu2 %201 }
 0x102   : > { %v205_v21 = vsel %vm141_vm3, %v202_v20, -inf }
 0x103   : > { %v206_v24 = vmax.f32 %v198_v13, %v205_v21 }
 0x111   : > { %v159_v17 = vpop.permute.xlu1 %158 }
 0x112   : > { %v164_v18 = vsel %vm140_vm2, %v159_v17, inf }
 0x113   : > { %v165_v19 = vmin.f32 %v153_v8, %v164_v18 }
 0x115   : > { %170 = vrot.lane.b32.xlu0 %v165_v19, %s528_s26 }
 0x119   : > { %v161_v22 = vpop.permute.xlu1 %160 }
 0x11a   : > { %v168_v23 = vsel %vm141_vm3, %v161_v22, inf }
 0x11b   : > { %v169_v25 = vmin.f32 %v157_v12, %v168_v23 }
 0x11d   : > { %209 = vrot.lane.b32.xlu0 %v206_v24, %s529_s27  ;;  %172 = vrot.lane.b32.xlu1 %v169_v25, %s529_s27 }
 0x157   : > { %v208_v26 = vpop.permute.xlu2 %207 }
 0x158   : > { %v211_v27 = vsel %vm142_vm4, %v208_v26, -inf }
 0x159   : > { %v212_v28 = vmax.f32 %v204_v16, %v211_v27 }
 0x15b   : > { %215 = vrot.lane.b32.xlu0 %v212_v28, %s530_s28 }
 0x187   : > { %v171_v29 = vpop.permute.xlu0 %170 }
 0x188   : > { %v176_v30 = vsel %vm142_vm4, %v171_v29, inf }
 0x189   : > { %v177_v31 = vmin.f32 %v165_v19, %v176_v30 }
 0x18b   : > { %182 = vrot.lane.b32.xlu1 %v177_v31, %s530_s28 }
 0x18f   : > { %v173_v32 = vpop.permute.xlu1 %172  ;;  %v210_v33 = vpop.permute.xlu0 %209 }
 0x190   : > { %v180_v34 = vsel %vm143_vm5, %v173_v32, inf  ;;  %v213_v35 = vsel %vm143_vm5, %v210_v33, -inf }
 0x191   : > { %v181_v36 = vmin.f32 %v169_v25, %v180_v34  ;;  %v214_v37 = vmax.f32 %v206_v24, %v213_v35 }
 0x193   : > { %184 = vrot.lane.b32.xlu2 %v181_v36, %s531_s29  ;;  %217 = vrot.lane.b32.xlu1 %v214_v37, %s531_s29 }
 0x1cd   : > { %v216_v39 = vpop.permute.xlu0 %215 }
 0x1ce   : > { %v219_v42 = vsel %vm144_vm6, %v216_v39, -inf }
 0x1cf   : > { %v220_v47 = vmax.f32 %v212_v28, %v219_v42 }
 0x1ed   : > { %v185_v40 = vpop.permute.xlu2 %184 }
 0x1ee   : > { %v192_v43 = vsel %vm145_vm7, %v185_v40, inf }
 0x1ef   : > { %v193_v48 = vmin.f32 %v181_v36, %v192_v43 }
 0x1fd   : > { %v183_v38 = vpop.permute.xlu1 %182 }
 0x1fe   : > { %v188_v41 = vsel %vm144_vm6, %v183_v38, inf }
 0x1ff   : > { %v189_v44 = vmin.f32 %v177_v31, %v188_v41 }
 0x201   : > { %v194_v50 = vmin.f32 %v189_v44, %v193_v48 }
 0x203   : > { %v242_v1 = vsub.f32 0.0, %v194_v50 }
 0x205   : > { %v218_v45 = vpop.permute.xlu1 %217 }
 0x206   : > { %v221_v46 = vsel %vm145_vm7, %v218_v45, -inf }
 0x207   : > { %v222_v49 = vmax.f32 %v214_v37, %v221_v46 }
 0x209   : > { %v223_v51 = vmax.f32 %v220_v47, %v222_v49 }
 0x20b   : > { %v224_v52 = vsub.f32 %v223_v51, %v194_v50 }
 0x20d   : > { %v225_v53 = vmul.f32 0.003921569, %v224_v52 }
 0x20f   : > { %v226_v54 = vmax.f32 %v225_v53, 1e-05 }
 0x211   : > { %v227_v55 = vmin.f32 %v226_v54, 10000.0 }
 0x213   : > { %424 = vrcp.f32 %v227_v55  ;;  %v239_v59 = vand.u32 2147483648, %v227_v55  ;;  %v237_v61 = vand.u32 2147483647, %v227_v55  ;;  %vm233_vm9 = vweird.f32 %v227_v55 }
 0x215   : > { %v240_v63 = vor.u32 1.1754944e-38, %v239_v59  ;;  %vm238_vm11 = vcmp.eq.f32.partialorder %v237_v61, 8.507059e+37 }
 0x219   : > { %v425_v56 = vpop.eup %424 }
 0x21a   : > { %v229_v57 = vmul.f32 %v425_v56, %v227_v55  ;;  %vm234_vm8 = vweird.f32 %v425_v56 }
 0x21b   : > { %vm235_vm10 = vmor %vm233_vm9, %vm234_vm8 }
 0x21c   : > { %v230_v58 = vsub.f32 1.0, %v229_v57 }
 0x21e   : > { %v231_v60 = vmul.f32 %v425_v56, %v230_v58 }
 0x220   : > { %v232_v62 = vadd.f32 %v425_v56, %v231_v60 }
 0x222   : > { %v236_v2 = vsel %vm235_vm10, %v425_v56, %v232_v62 }
 0x223   : > { %v241_v3 = vsel %vm238_vm11, %v240_v63, %v236_v2 }
 0x224   : > { %v243_v4 = vmul.f32 %v242_v1, %v241_v3  ;;  %v247_v5 = vmul.f32 %v241_v3, %v638_v0 }
 0x226   : > { %v349_v6 = vclamps-f32 %v243_v4, 10000.0  ;;  %v364_v7 = vcvt.f32.s32 %v247_v5  ;;  %v367_v15 = vand.u32 2147483648, %v247_v5  ;;  %v362_v16 = vand.u32 2147483647, %v247_v5 }
 0x228   : > { %v356_v8 = vcvt.f32.s32 %v349_v6  ;;  %v365_v9 = vcvt.s32.f32 %v364_v7  ;;  %v354_v11 = vand.u32 2147483647, %v349_v6  ;;  %v359_v14 = vand.u32 2147483648, %v349_v6 }
 0x229   : > { %vm363_vm13 = vcmp.lt.f32.partialorder %v362_v16, 8388608.0 }
 0x22a   : > { %v357_v10 = vcvt.s32.f32 %v356_v8  ;;  %v366_v12 = vand.u32 2147483647, %v365_v9  ;;  %vm355_vm12 = vcmp.lt.f32.partialorder %v354_v11, 8388608.0 }
 0x22c   : > { %v358_v13 = vand.u32 2147483647, %v357_v10  ;;  %v368_v18 = vor.u32 %v367_v15, %v366_v12 }
 0x22e   : > { %v360_v17 = vor.u32 %v359_v14, %v358_v13  ;;  %v369_v20 = vsel %vm363_vm13, %v368_v18, %v247_v5 }
 0x230   : > { %v361_v19 = vsel %vm355_vm12, %v360_v17, %v349_v6 }
 0x231   : > { %v249_v0 = vsub.f32 0.0, %v361_v19  ;;  %v250_v21 = vsub.f32 255.0, %v361_v19 }
 0x233   : > { %v251_v22 = vmax.f32 %v249_v0, %v369_v20 }
 0x235   : > { %v252_v23 = vmin.f32 %v250_v21, %v251_v22 }
 0x237   : > { %v253_v24 = vmul.f32 %v252_v23, %v227_v55 }
 0x239   : > { %254 = vst [vmem:[%s133_s5] sm:$0xff] %v253_v24 }
 0x23a   : > { %483 = shalt.err (!%p480_p4)
}
 0x23b   : > { %372 = dma.vmem_to_hbm [thread:$0]  (%p592_p11), %s269_s11, 128, %s271_s13, %s256_s10  }
 0x23c PF: > { %s282_s16 = sand.u32 1, %s510_s6   ;;  %p699_p7 = scmp.ge.s32.totalorder %s522_s9, 2 }
 0x23d   : > { %s283_s25 = scalar_lea.sflag [#allocation4], %s282_s16 }
 0x23e   : > { %p379_p5 = pnand %p699_p7, %p596_p12 }
 0x240   : > { %p380_p8 = pneg %p379_p5 }
 0x242   : > { %505 = dma.done.wait (%p380_p8), %s283_s25, 128  }
 0x243   : > { %507 = vsyncadd (%p380_p8), %s283_s25, 4294967168  ;;  %p14_p10 = scmp.ge.s32.totalorder %s567_s12, 4   ;;  %s700_s6 = smov %s514_s7 }
 0x244   : > { %s701_s7 = smov %s518_s8  ;;  %s702_s8 = smov %s579_s15 }
 0x245   : > { %s703_s9 = smov %s567_s12  ;;  %16 = sbr.rel (!%p14_p10) target bundleno = 5 (0x5), region = 69 }
 0x24a   :  { %289 = vsyncpa [#allocation3], 1 }
 0x24b   :  { %291 = vsyncpa [#allocation3 + $0x1], 1 }
 0x24c   :  { %292 = vsyncpa [#allocation4], 1 }
 0x24d   :  { %294 = vsyncpa [#allocation4 + $0x1], 1 }

</bundles_post_ra>
